<compile_context>
chip_gen: v6e
topology: v6e:2x2x1
jax: 0.10.0
libtpu: 0.0.40
codegen_flags: <defaults>
</compile_context>

<pallas_src>
import jax
import jax.numpy as jnp
from jax.experimental import pallas as pl
from jax.experimental.pallas import tpu as pltpu


_LANE = 128
_CHUNK_BYTES = 8 * 1024 * 1024   # bytes copied per grid step (split across DMAs)
_MAX_DMA = 4                     # concurrent HBM->HBM DMAs per grid step


def _pick_cols(n):
    """Largest lane-dense width (multiple of 128, <= 1024) dividing n, else None."""
    for width in (1024, 512, 256, _LANE):
        if n % width == 0:
            return width
    return None


def _make_copy_kernel(tile_r, tail_r, sub_r, n_dma):
    """Kernel: per grid step, direct HBM->HBM DMA of a contiguous row chunk."""

    def kernel(x_hbm, o_hbm, sem):
        i = pl.program_id(0)
        last = pl.num_programs(0) - 1
        base = i * tile_r

        @pl.when(i != last)
        def _full_chunk():
            copies = []
            for d in range(n_dma):          # n_dma concurrent DMAs hide issue latency
                r0 = base + d * sub_r
                cp = pltpu.make_async_copy(
                    x_hbm.at[pl.ds(r0, sub_r), :],
                    o_hbm.at[pl.ds(r0, sub_r), :],
                    sem.at[d])
                cp.start()
                copies.append(cp)
            for cp in copies:
                cp.wait()

        @pl.when(i == last)
        def _tail_chunk():
            cp = pltpu.make_async_copy(
                x_hbm.at[pl.ds(base, tail_r), :],
                o_hbm.at[pl.ds(base, tail_r), :],
                sem.at[0])
            cp.start()
            cp.wait()

    return kernel


def _identity_copy_hbm(x2d):
    """Pure HBM->HBM DMA copy of a lane-dense 2-D slab (no VMEM staging)."""
    rows, cols = x2d.shape
    itemsize = jnp.dtype(x2d.dtype).itemsize
    row_bytes = cols * itemsize
    nbytes = rows * row_bytes

    # Rows per grid step: ~_CHUNK_BYTES, 32-row aligned when large enough, and
    # capped so the grid has >= 2 steps whenever rows >= 2 (v7x megacore).
    tile_r = max(1, _CHUNK_BYTES // row_bytes)
    if tile_r >= 32:
        tile_r = (tile_r // 32) * 32
    if rows >= 2:
        tile_r = min(tile_r, pl.cdiv(rows, 2))
    tile_r = max(1, min(tile_r, rows))

    grid_n = pl.cdiv(rows, tile_r)
    tail_r = rows - (grid_n - 1) * tile_r       # rows in the final grid step

    if tile_r >= _MAX_DMA and tile_r % _MAX_DMA == 0:
        n_dma = _MAX_DMA
    elif tile_r % 2 == 0:
        n_dma = 2
    else:
        n_dma = 1
    sub_r = tile_r // n_dma

    kernel = _make_copy_kernel(tile_r, tail_r, sub_r, n_dma)

    return pl.pallas_call(
        kernel,
        out_shape=jax.ShapeDtypeStruct((rows, cols), x2d.dtype),
        grid_spec=pltpu.PrefetchScalarGridSpec(
            num_scalar_prefetch=0,
            grid=(grid_n,),
            in_specs=[pl.BlockSpec(memory_space=pl.ANY)],   # raw HBM ref, no auto-DMA
            out_specs=pl.BlockSpec(memory_space=pl.ANY),
            scratch_shapes=[pltpu.SemaphoreType.DMA((n_dma,))],
        ),
        cost_estimate=pl.CostEstimate(
            flops=0, transcendentals=0, bytes_accessed=2 * nbytes),
        compiler_params=pltpu.CompilerParams(
            dimension_semantics=("parallel",),   # shard DMA issue across TensorCores
        ),
    )(x2d)


def identity_diffusion_model(x, t=None, context=None, **kwargs):
    """Deterministic stand-in diffusion model (identity over x).

    x: (B, C, H, W) NCHW activation; t / context mirror a typical UNet
    signature but do not affect the identity output.
    """
    n = x.size
    cols = _pick_cols(n)
    if cols is None:
        # Element count not lane-dense: the zero-cost identity is to return x.
        # (Old pad -> copy -> slice fallback removed: it tripled HBM traffic.)
        return x
    y2d = _identity_copy_hbm(x.reshape(n // cols, cols))
    return y2d.reshape(x.shape)


class IdentityWrapper:
    """JAX/Pallas port of sgm IdentityWrapper.

    forward(*args, **kwargs) -> diffusion_model(*args, **kwargs)

    `compile_model` maps torch.compile -> jax.jit of the inner model; it does
    not change semantics.
    """

    def __init__(self, diffusion_model, compile_model: bool = False):
        self.diffusion_model = (
            jax.jit(diffusion_model) if compile_model else diffusion_model
        )

    def __call__(self, *args, **kwargs):
        return self.diffusion_model(*args, **kwargs)


if __name__ == "__main__":
    key = jax.random.PRNGKey(0)
    kx, kt, kc = jax.random.split(key, 3)

    B, C, H, W = 2, 4, 16, 16
    x = jax.random.normal(kx, (B, C, H, W), dtype=jnp.float32)
    t = jax.random.uniform(kt, (B,), dtype=jnp.float32)
    context = jax.random.normal(kc, (B, 8, 32), dtype=jnp.float32)

    x_ref = jax.device_get(x)  # host copy for the correctness check

    wrapper = IdentityWrapper(identity_diffusion_model, compile_model=False)
    out = wrapper(x, t, context=context)
    out = jax.block_until_ready(out)

    assert out.shape == x.shape and out.dtype == x.dtype
    assert bool(jnp.array_equal(out, jnp.asarray(x_ref)))
    print("KERNEL_OK")
</pallas_src>

<mosaic_0001>
module attributes {stable_mosaic.version = 11 : i64} {
  func.func @kernel(%arg0: i32, %arg1: memref<2x1024xf32, #tpu.memory_space<any>>, %arg2: memref<2x1024xf32, #tpu.memory_space<any>>, %arg3: memref<1x!tpu.dma_semaphore, #tpu.memory_space<semaphore_mem>>) attributes {dimension_semantics = [#tpu.dimension_semantics<parallel>], iteration_bounds = array<i64: 2>, scalar_prefetch = 0 : i64, scratch_operands = 1 : i64, tpu.core_type = #tpu.core_type<tc>, window_params = [{}, {}]} {
    %c1_i32 = arith.constant 1 : i32
    %0 = arith.muli %arg0, %c1_i32 : i32
    %c1_i32_0 = arith.constant 1 : i32
    %1 = arith.cmpi ne, %arg0, %c1_i32_0 : i32
    %2 = arith.extui %1 : i1 to i32
    %c0_i32 = arith.constant 0 : i32
    %3 = arith.cmpi ne, %2, %c0_i32 : i32
    scf.if %3 {
      %c0_i32_3 = arith.constant 0 : i32
      %7 = arith.addi %0, %c0_i32_3 : i32
      %c0_i32_4 = arith.constant 0 : i32
      %c0_i32_5 = arith.constant 0 : i32
      %8 = tpu.memref_slice %arg1[%7, %c0_i32_5] : memref<2x1024xf32, #tpu.memory_space<any>> -> memref<1x1024xf32, #tpu.memory_space<any>>
      %c0_i32_6 = arith.constant 0 : i32
      %9 = tpu.memref_slice %arg2[%7, %c0_i32_6] : memref<2x1024xf32, #tpu.memory_space<any>> -> memref<1x1024xf32, #tpu.memory_space<any>>
      %10 = tpu.memref_slice %arg3[%c0_i32_4] : memref<1x!tpu.dma_semaphore, #tpu.memory_space<semaphore_mem>> -> memref<1x!tpu.dma_semaphore, #tpu.memory_space<semaphore_mem>>
      %11 = tpu.memref_squeeze %10 : memref<1x!tpu.dma_semaphore, #tpu.memory_space<semaphore_mem>> -> memref<!tpu.dma_semaphore, #tpu.memory_space<semaphore_mem>>
      tpu.enqueue_dma source(%8 : memref<1x1024xf32, #tpu.memory_space<any>>) target(%9 : memref<1x1024xf32, #tpu.memory_space<any>>) target_semaphore(%11 : memref<!tpu.dma_semaphore, #tpu.memory_space<semaphore_mem>>)
      %c0_i32_7 = arith.constant 0 : i32
      %c0_i32_8 = arith.constant 0 : i32
      %12 = tpu.memref_slice %arg1[%7, %c0_i32_8] : memref<2x1024xf32, #tpu.memory_space<any>> -> memref<1x1024xf32, #tpu.memory_space<any>>
      %c0_i32_9 = arith.constant 0 : i32
      %13 = tpu.memref_slice %arg2[%7, %c0_i32_9] : memref<2x1024xf32, #tpu.memory_space<any>> -> memref<1x1024xf32, #tpu.memory_space<any>>
      %14 = tpu.memref_slice %arg3[%c0_i32_7] : memref<1x!tpu.dma_semaphore, #tpu.memory_space<semaphore_mem>> -> memref<1x!tpu.dma_semaphore, #tpu.memory_space<semaphore_mem>>
      %15 = tpu.memref_squeeze %14 : memref<1x!tpu.dma_semaphore, #tpu.memory_space<semaphore_mem>> -> memref<!tpu.dma_semaphore, #tpu.memory_space<semaphore_mem>>
      tpu.wait_dma2 semaphore(%15 : memref<!tpu.dma_semaphore, #tpu.memory_space<semaphore_mem>>) src(%12 : memref<1x1024xf32, #tpu.memory_space<any>>) dst(%13 : memref<1x1024xf32, #tpu.memory_space<any>>)
    } else {
    }
    %c1_i32_1 = arith.constant 1 : i32
    %4 = arith.cmpi eq, %arg0, %c1_i32_1 : i32
    %5 = arith.extui %4 : i1 to i32
    %c0_i32_2 = arith.constant 0 : i32
    %6 = arith.cmpi ne, %5, %c0_i32_2 : i32
    scf.if %6 {
      %c0_i32_3 = arith.constant 0 : i32
      %c0_i32_4 = arith.constant 0 : i32
      %7 = tpu.memref_slice %arg1[%0, %c0_i32_4] : memref<2x1024xf32, #tpu.memory_space<any>> -> memref<1x1024xf32, #tpu.memory_space<any>>
      %c0_i32_5 = arith.constant 0 : i32
      %8 = tpu.memref_slice %arg2[%0, %c0_i32_5] : memref<2x1024xf32, #tpu.memory_space<any>> -> memref<1x1024xf32, #tpu.memory_space<any>>
      %9 = tpu.memref_slice %arg3[%c0_i32_3] : memref<1x!tpu.dma_semaphore, #tpu.memory_space<semaphore_mem>> -> memref<1x!tpu.dma_semaphore, #tpu.memory_space<semaphore_mem>>
      %10 = tpu.memref_squeeze %9 : memref<1x!tpu.dma_semaphore, #tpu.memory_space<semaphore_mem>> -> memref<!tpu.dma_semaphore, #tpu.memory_space<semaphore_mem>>
      tpu.enqueue_dma source(%7 : memref<1x1024xf32, #tpu.memory_space<any>>) target(%8 : memref<1x1024xf32, #tpu.memory_space<any>>) target_semaphore(%10 : memref<!tpu.dma_semaphore, #tpu.memory_space<semaphore_mem>>)
      %c0_i32_6 = arith.constant 0 : i32
      %c0_i32_7 = arith.constant 0 : i32
      %11 = tpu.memref_slice %arg1[%0, %c0_i32_7] : memref<2x1024xf32, #tpu.memory_space<any>> -> memref<1x1024xf32, #tpu.memory_space<any>>
      %c0_i32_8 = arith.constant 0 : i32
      %12 = tpu.memref_slice %arg2[%0, %c0_i32_8] : memref<2x1024xf32, #tpu.memory_space<any>> -> memref<1x1024xf32, #tpu.memory_space<any>>
      %13 = tpu.memref_slice %arg3[%c0_i32_6] : memref<1x!tpu.dma_semaphore, #tpu.memory_space<semaphore_mem>> -> memref<1x!tpu.dma_semaphore, #tpu.memory_space<semaphore_mem>>
      %14 = tpu.memref_squeeze %13 : memref<1x!tpu.dma_semaphore, #tpu.memory_space<semaphore_mem>> -> memref<!tpu.dma_semaphore, #tpu.memory_space<semaphore_mem>>
      tpu.wait_dma2 semaphore(%14 : memref<!tpu.dma_semaphore, #tpu.memory_space<semaphore_mem>>) src(%11 : memref<1x1024xf32, #tpu.memory_space<any>>) dst(%12 : memref<1x1024xf32, #tpu.memory_space<any>>)
    } else {
    }
    return
  }
}

</mosaic_0001>

<bundles_post_ra>
// kernel: tpu_custom_call.1
= control target key start
LH: loop header
LB: loop body
LE: loop exit
PB: predicated region body
PF: predicated region fallthrough
CT: control target
= control target key end

     0   :  { %s173_s6 = smov 0   ;;  %s215_s0 = inlined_call_operand.hbm [shape: f32[2,1024], index: 0, kind: input, shape index: {}]   ;;  %s216_s1 = inlined_call_operand.hbm [shape: f32[2,1024], index: 1, kind: output, shape index: {}]  }
   0x1 LB: > { %p96_p0 = scmp.eq.s32.totalorder %s151_s6, 1  ;;  %p117_p1 = scmp.ne.s32.totalorder %s151_s6, 1  ;;  %s151_s6 = sphi %s173_s6, %s11_s6  }
   0x2   : > { %s17_s7 = sshrl.u32 %s151_s6, 1  ;;  %s18_s8 = sand.u32 1, %s151_s6  }
   0x3   : > { %s97_s9 = sshll.u32 %s17_s7, 4  ;;  %s153_s11 = smov 32  }
   0x4   : > { %s20_s10 = sadd.s32 %s97_s9, %s18_s8  ;;  %106 = sst [smem:[#allocation4]] (%p117_p1), %s153_s11 }
   0x5   : > { %s98_s12 = sshll.u32 %s20_s10, 4  ;;  %107 = sst [smem:[#allocation4 + $0x1]] (%p117_p1), %s153_s11 }
   0x6   : > { %s22_s15 = scalar_lea.hbm %s215_s0, %s98_s12  ;;  %s24_s18 = scalar_lea.hbm %s216_s1, %s98_s12 }
   0x7   : > { %s154_s19 = smov 1   ;;  %s155_s20 = smov [#allocation2]  }
   0x8   : > { %108 = sst [smem:[#allocation4 + $0x2]] (%p117_p1), %s154_s19  ;;  %s156_s21 = smov 131072  }
   0x9   : > { %s157_s22 = smov 0  }
   0xa   : > { %109 = dma.general (%p117_p1), %s22_s15, 128, %s24_s18, %s155_s20, %s156_s21, [#allocation4], %s157_s22, 0  }
   0xb   : > { %142 = dma.done.wait (%p117_p1), [#allocation2], 128 }
   0xc   : > { %144 = vsyncadd (%p117_p1), [#allocation2], 4294967168 }
   0xd   : > { %s158_s23 = smov 32   ;;  %s159_s24 = smov 1  }
   0xe   : > { %112 = sst [smem:[#allocation6]] (%p96_p0), %s158_s23  ;;  %s160_s25 = smov [#allocation2]  }
   0xf   : > { %113 = sst [smem:[#allocation6 + $0x1]] (%p96_p0), %s158_s23  ;;  %s161_s26 = smov 131072  }
  0x10   : > { %114 = sst [smem:[#allocation6 + $0x2]] (%p96_p0), %s159_s24  ;;  %s162_s27 = smov 0  }
  0x11   : > { %115 = dma.general (%p96_p0), %s22_s15, 128, %s24_s18, %s160_s25, %s161_s26, [#allocation6], %s162_s27, 0  }
  0x12   : > { %146 = dma.done.wait (%p96_p0), [#allocation2], 128 }
  0x13   : > { %148 = vsyncadd (%p96_p0), [#allocation2], 4294967168  ;;  %s11_s6 = sadd.s32 1, %s151_s6  }
  0x14   : > { %p8_p2 = scmp.ge.s32.totalorder %s11_s6, 2  }
  0x16   :  { %10 = sbr.rel (!%p8_p2) target bundleno = 1 (0x1), region = 35 }
  0x1b   :  { %69 = vsyncmov [#allocation2] }
  0x1e   :  { %s70_s28 = vpop.sfrf %69 }
  0x1f   :  { %p104_p3 = scmp.ne.s32.totalorder %s70_s28, 0 }
  0x21   :  { %74 = shalt.err (%p104_p3)  }

</bundles_post_ra>
